<compile_context>
chip_gen: v6e
topology: v6e:2x2x1
jax: 0.10.0
libtpu: 0.0.40
codegen_flags: <defaults>
</compile_context>

<pallas_src>
import functools

import jax
import jax.numpy as jnp
from jax import lax
from jax.experimental import pallas as pl
from jax.experimental.pallas import tpu as pltpu


def attention_kernel(x_ref, wq_ref, wk_ref, wv_ref, wproj_ref, bproj_ref,
                     o_ref, acc_ref, *, tq, n_q):
    """Grid = (B, H); one step = one (batch, head) pair.

    x_ref     : (1, N, C)   activations (resident across the head axis)
    wq_ref    : (1, C, hd)  per-head q weight (1/sqrt(hd) pre-folded)
    wk_ref    : (1, C, hd)  per-head k weight
    wv_ref    : (1, C, hd)  per-head v weight
    wproj_ref : (1, hd, C)  per-head slab of the output projection
    bproj_ref : (1, C)      output projection bias
    o_ref     : (1, N, C)   output (written only on the last head step)
    acc_ref   : (N, C) f32  cross-head accumulator (VMEM scratch)
    """
    h = pl.program_id(1)
    last_h = pl.num_programs(1) - 1
    compute_dtype = x_ref.dtype

    @pl.when(h == 0)
    def _init():
        # Seed the accumulator with the projection bias: it is added exactly
        # once per output row, so the finalize step needs no extra add.
        acc_ref[...] = jnp.broadcast_to(
            bproj_ref[...].astype(jnp.float32), acc_ref.shape)

    wq = wq_ref[0]            # (C, hd)
    wk = wk_ref[0]            # (C, hd)
    wv = wv_ref[0]            # (C, hd)
    wp = wproj_ref[0]         # (hd, C)

    x_full = x_ref[0]         # (N, C)
    # k / v over the full sequence, computed once per (batch, head).
    k = jnp.dot(x_full, wk, preferred_element_type=jnp.float32).astype(compute_dtype)
    v = jnp.dot(x_full, wv, preferred_element_type=jnp.float32).astype(compute_dtype)

    def q_tile_body(row0):
        xq = x_ref[0, pl.ds(row0, tq), :]                               # (tq, C)
        q = jnp.dot(xq, wq, preferred_element_type=jnp.float32).astype(compute_dtype)
        # scores = q @ k.T : contract head_dim of both operands (no transpose op)
        s = lax.dot_general(q, k, (((1,), (1,)), ((), ())),
                            preferred_element_type=jnp.float32)          # (tq, N)
        s = s - jnp.max(s, axis=-1, keepdims=True)                       # stable softmax
        p = jnp.exp(s)
        denom = jnp.sum(p, axis=-1, keepdims=True)                       # (tq, 1)
        # deferred normalization: scale the small (tq, hd) result, not (tq, N)
        o_un = jnp.dot(p.astype(compute_dtype), v,
                       preferred_element_type=jnp.float32)               # (tq, hd)
        o = o_un * pl.reciprocal(denom, approx=False)
        # fold this head directly into the output projection
        y = jnp.dot(o.astype(compute_dtype), wp,
                    preferred_element_type=jnp.float32)                  # (tq, C)

        @pl.when(h != last_h)
        def _accumulate():
            acc_ref[pl.ds(row0, tq), :] += y

        @pl.when(h == last_h)
        def _write_out():
            # fused finalize: bias already lives in acc (init), so this is the
            # final value for these rows.
            o_ref[0, pl.ds(row0, tq), :] = (
                acc_ref[pl.ds(row0, tq), :] + y).astype(o_ref.dtype)

    if n_q == 1:
        q_tile_body(0)
    else:
        @pl.loop(0, n_q)
        def _(i):
            q_tile_body(pl.multiple_of(i * tq, tq))


def attention_pallas(x, wqkv, wproj, bproj, num_heads, *, q_tile=256):
    """x: (B, N, C); wqkv: (3*A, C); wproj: (C, A); bproj: (C,)."""
    B, N, C = x.shape
    A = wqkv.shape[0] // 3
    H = num_heads
    hd = A // H
    scale = hd ** (-0.5)

    # ---- one-time, glue-side weight reorganization (lane-aligned, per head)
    Wq = wqkv[:A].reshape(H, hd, C)
    Wk = wqkv[A:2 * A].reshape(H, hd, C)
    Wv = wqkv[2 * A:].reshape(H, hd, C)
    wq_t = (jnp.swapaxes(Wq, 1, 2) * scale).astype(x.dtype)   # (H, C, hd), scale folded
    wk_t = jnp.swapaxes(Wk, 1, 2).astype(x.dtype)             # (H, C, hd)
    wv_t = jnp.swapaxes(Wv, 1, 2).astype(x.dtype)             # (H, C, hd)
    wproj_h = wproj.T.reshape(H, hd, C).astype(x.dtype)       # (H, hd, C)
    bproj2 = bproj.reshape(1, C).astype(x.dtype)

    # ---- q-tile size: bounds the (tq, N) score matrix
    tq = q_tile if (N % q_tile == 0) else N
    n_q = N // tq

    kernel = functools.partial(attention_kernel, tq=tq, n_q=n_q)

    # ---- VMEM budget (explicit limit; keeps v7x's 64 MiB in mind)
    itemsize = x.dtype.itemsize
    vmem_need = (2 * N * C * itemsize            # x, double-buffered
                 + 2 * N * C * itemsize          # out, double-buffered
                 + 4 * N * C                     # f32 accumulator scratch
                 + 2 * 4 * C * hd * itemsize     # per-head weights, double-buffered
                 + 4 * tq * N                    # score tile
                 + 2 * 4 * N * hd                # k, v
                 + (1 << 20))                    # slack
    vmem_limit = int(min(64 * 1024 * 1024, max(16 * 1024 * 1024, 2 * vmem_need)))

    cost = pl.CostEstimate(
        flops=int(2 * B * N * C * 3 * A          # qkv
                  + 4 * B * H * N * N * hd       # scores + p@v
                  + 2 * B * N * A * C),          # output projection
        transcendentals=int(B * H * N * N),      # exp
        bytes_accessed=int((x.size + wqkv.size + wproj.size + bproj.size
                            + B * N * C) * itemsize),
    )

    return pl.pallas_call(
        kernel,
        out_shape=jax.ShapeDtypeStruct((B, N, C), x.dtype),
        grid_spec=pltpu.PrefetchScalarGridSpec(
            num_scalar_prefetch=0,
            grid=(B, H),
            in_specs=[
                pl.BlockSpec((1, N, C), lambda b, h: (b, 0, 0)),
                pl.BlockSpec((1, C, hd), lambda b, h: (h, 0, 0)),
                pl.BlockSpec((1, C, hd), lambda b, h: (h, 0, 0)),
                pl.BlockSpec((1, C, hd), lambda b, h: (h, 0, 0)),
                pl.BlockSpec((1, hd, C), lambda b, h: (h, 0, 0)),
                pl.BlockSpec((1, C), lambda b, h: (0, 0)),
            ],
            out_specs=pl.BlockSpec((1, N, C), lambda b, h: (b, 0, 0)),
            scratch_shapes=[pltpu.VMEM((N, C), jnp.float32)],
        ),
        compiler_params=pltpu.CompilerParams(
            dimension_semantics=("parallel", "arbitrary"),
            vmem_limit_bytes=vmem_limit),
        cost_estimate=cost,
    )(x, wq_t, wk_t, wv_t, wproj_h, bproj2)


def attention_reference(x, wqkv, wproj, bproj, num_heads):
    """Plain-JAX transcription of the PyTorch forward (for verification)."""
    B, N, C = x.shape
    A = wqkv.shape[0] // 3
    hd = A // num_heads
    scale = hd ** (-0.5)
    qkv = x @ wqkv.T                                      # (B, N, 3A)
    qkv = qkv.reshape(B, N, 3, num_heads, hd).transpose(2, 0, 3, 1, 4)
    q, k, v = qkv[0] * scale, qkv[1], qkv[2]              # (B, H, N, hd)
    attn = jax.nn.softmax(q @ jnp.swapaxes(k, -2, -1), axis=-1)
    o = (attn @ v).transpose(0, 2, 1, 3).reshape(B, N, A)
    return o @ wproj.T + bproj


if __name__ == "__main__":
    key = jax.random.PRNGKey(0)

    # --- Test 1: small shapes consistent with the module (dim=32, heads=4).
    B, N, C = 2, 8, 32
    num_heads = 4
    all_head_dim = C

    kx, kqkv, kproj, kb = jax.random.split(key, 4)
    x = jax.random.normal(kx, (B, N, C), dtype=jnp.float32)
    wqkv = 0.05 * jax.random.normal(kqkv, (3 * all_head_dim, C), dtype=jnp.float32)
    wproj = 0.05 * jax.random.normal(kproj, (C, all_head_dim), dtype=jnp.float32)
    bproj = 0.01 * jax.random.normal(kb, (C,), dtype=jnp.float32)

    out = attention_pallas(x, wqkv, wproj, bproj, num_heads)
    out = jax.block_until_ready(out)
    ref = attention_reference(x, wqkv, wproj, bproj, num_heads)
    assert out.shape == (B, N, C)
    assert jnp.allclose(out, ref, atol=1e-5, rtol=1e-5), "mismatch vs reference (small)"

    # --- Test 2: a longer sequence that exercises the multi-q-tile path.
    B2, N2, C2, H2 = 2, 256, 128, 4
    kx2, kqkv2, kproj2, kb2 = jax.random.split(jax.random.PRNGKey(1), 4)
    x2 = jax.random.normal(kx2, (B2, N2, C2), dtype=jnp.float32)
    wqkv2 = 0.05 * jax.random.normal(kqkv2, (3 * C2, C2), dtype=jnp.float32)
    wproj2 = 0.05 * jax.random.normal(kproj2, (C2, C2), dtype=jnp.float32)
    bproj2 = 0.01 * jax.random.normal(kb2, (C2,), dtype=jnp.float32)

    out2 = attention_pallas(x2, wqkv2, wproj2, bproj2, H2, q_tile=128)
    out2 = jax.block_until_ready(out2)
    ref2 = attention_reference(x2, wqkv2, wproj2, bproj2, H2)
    assert out2.shape == (B2, N2, C2)
    assert jnp.allclose(out2, ref2, atol=1e-4, rtol=1e-4), "mismatch vs reference (tiled)"

    print("KERNEL_OK")
</pallas_src>

<mosaic_0001>
module attributes {stable_mosaic.version = 11 : i64} {
  func.func @attention_kernel(%arg0: i32, %arg1: i32, %arg2: memref<1x8x32xf32, #tpu.memory_space<vmem>>, %arg3: memref<1x32x8xf32, #tpu.memory_space<vmem>>, %arg4: memref<1x32x8xf32, #tpu.memory_space<vmem>>, %arg5: memref<1x32x8xf32, #tpu.memory_space<vmem>>, %arg6: memref<1x8x32xf32, #tpu.memory_space<vmem>>, %arg7: memref<1x32xf32, #tpu.memory_space<vmem>>, %arg8: memref<1x8x32xf32, #tpu.memory_space<vmem>>, %arg9: memref<8x32xf32, #tpu.memory_space<vmem>>) attributes {dimension_semantics = [#tpu.dimension_semantics<parallel>, #tpu.dimension_semantics<arbitrary>], iteration_bounds = array<i64: 2, 4>, scalar_prefetch = 0 : i64, scratch_operands = 1 : i64, tpu.core_type = #tpu.core_type<tc>, window_params = [{transform_indices = @transform_0, window_bounds = array<i64: 1, 8, 32>}, {transform_indices = @transform_1, window_bounds = array<i64: 1, 32, 8>}, {transform_indices = @transform_2, window_bounds = array<i64: 1, 32, 8>}, {transform_indices = @transform_3, window_bounds = array<i64: 1, 32, 8>}, {transform_indices = @transform_4, window_bounds = array<i64: 1, 8, 32>}, {pipeline_mode = #tpu.pipeline_mode<synchronous>, transform_indices = @transform_5, window_bounds = array<i64: 1, 32>}, {transform_indices = @transform_6, window_bounds = array<i64: 1, 8, 32>}]} {
    %c0_i32 = arith.constant 0 : i32
    %0 = arith.cmpi eq, %arg1, %c0_i32 : i32
    %1 = arith.extui %0 : i1 to i32
    %c0_i32_0 = arith.constant 0 : i32
    %2 = arith.cmpi ne, %1, %c0_i32_0 : i32
    scf.if %2 {
      %c0_28 = arith.constant 0 : index
      %c0_29 = arith.constant 0 : index
      %37 = vector.load %arg7[%c0_28, %c0_29] : memref<1x32xf32, #tpu.memory_space<vmem>>, vector<1x32xf32>
      %38 = vector.shape_cast %37 : vector<1x32xf32> to vector<1x32xf32>
      %39 = vector.broadcast %38 : vector<1x32xf32> to vector<8x32xf32>
      %c0_30 = arith.constant 0 : index
      %c0_31 = arith.constant 0 : index
      %40 = vector.load %arg9[%c0_30, %c0_31] : memref<8x32xf32, #tpu.memory_space<vmem>>, vector<8x32xf32>
      tpu.vector_store %arg9[%c0_30, %c0_31], %39 {strides = array<i32>} : memref<8x32xf32, #tpu.memory_space<vmem>>, vector<8x32xf32>,
    } else {
    }
    %c0 = arith.constant 0 : index
    %c0_1 = arith.constant 0 : index
    %c0_2 = arith.constant 0 : index
    %3 = vector.load %arg3[%c0, %c0_1, %c0_2] : memref<1x32x8xf32, #tpu.memory_space<vmem>>, vector<1x32x8xf32>
    %4 = vector.shape_cast %3 : vector<1x32x8xf32> to vector<32x8xf32>
    %c0_3 = arith.constant 0 : index
    %c0_4 = arith.constant 0 : index
    %c0_5 = arith.constant 0 : index
    %5 = vector.load %arg4[%c0_3, %c0_4, %c0_5] : memref<1x32x8xf32, #tpu.memory_space<vmem>>, vector<1x32x8xf32>
    %6 = vector.shape_cast %5 : vector<1x32x8xf32> to vector<32x8xf32>
    %c0_6 = arith.constant 0 : index
    %c0_7 = arith.constant 0 : index
    %c0_8 = arith.constant 0 : index
    %7 = vector.load %arg5[%c0_6, %c0_7, %c0_8] : memref<1x32x8xf32, #tpu.memory_space<vmem>>, vector<1x32x8xf32>
    %8 = vector.shape_cast %7 : vector<1x32x8xf32> to vector<32x8xf32>
    %c0_9 = arith.constant 0 : index
    %c0_10 = arith.constant 0 : index
    %c0_11 = arith.constant 0 : index
    %9 = vector.load %arg6[%c0_9, %c0_10, %c0_11] : memref<1x8x32xf32, #tpu.memory_space<vmem>>, vector<1x8x32xf32>
    %10 = vector.shape_cast %9 : vector<1x8x32xf32> to vector<8x32xf32>
    %c0_12 = arith.constant 0 : index
    %c0_13 = arith.constant 0 : index
    %c0_14 = arith.constant 0 : index
    %11 = vector.load %arg2[%c0_12, %c0_13, %c0_14] : memref<1x8x32xf32, #tpu.memory_space<vmem>>, vector<1x8x32xf32>
    %12 = vector.shape_cast %11 : vector<1x8x32xf32> to vector<8x32xf32>
    %cst = arith.constant dense<0.000000e+00> : vector<8x8xf32>
    %13 = tpu.matmul %12, %6, %cst {dimension_numbers = #tpu.dot_dimension_numbers<[1], [0], [0], [1], [0, 0, 1, 1], [], []>} : vector<8x32xf32>, vector<32x8xf32>, vector<8x8xf32> -> vector<8x8xf32>
    %cst_15 = arith.constant dense<0.000000e+00> : vector<8x8xf32>
    %14 = tpu.matmul %12, %8, %cst_15 {dimension_numbers = #tpu.dot_dimension_numbers<[1], [0], [0], [1], [0, 0, 1, 1], [], []>} : vector<8x32xf32>, vector<32x8xf32>, vector<8x8xf32> -> vector<8x8xf32>
    %c0_16 = arith.constant 0 : index
    %c0_17 = arith.constant 0 : index
    %c0_18 = arith.constant 0 : index
    %15 = vector.load %arg2[%c0_16, %c0_17, %c0_18] : memref<1x8x32xf32, #tpu.memory_space<vmem>>, vector<1x8x32xf32>
    %16 = vector.shape_cast %15 : vector<1x8x32xf32> to vector<8x32xf32>
    %cst_19 = arith.constant dense<0.000000e+00> : vector<8x8xf32>
    %17 = tpu.matmul %16, %4, %cst_19 {dimension_numbers = #tpu.dot_dimension_numbers<[1], [0], [0], [1], [0, 0, 1, 1], [], []>} : vector<8x32xf32>, vector<32x8xf32>, vector<8x8xf32> -> vector<8x8xf32>
    %cst_20 = arith.constant dense<0.000000e+00> : vector<8x8xf32>
    %18 = tpu.matmul %17, %13, %cst_20 {dimension_numbers = #tpu.dot_dimension_numbers<[1], [1], [0], [0], [0, 0, 1, 0], [], []>} : vector<8x8xf32>, vector<8x8xf32>, vector<8x8xf32> -> vector<8x8xf32>
    %cst_21 = arith.constant dense<0xFF800000> : vector<8xf32>
    %19 = vector.multi_reduction <maximumf>, %18, %cst_21 [1] : vector<8x8xf32> to vector<8xf32>
    %20 = vector.shape_cast %19 : vector<8xf32> to vector<8x1xf32>
    %21 = vector.broadcast %20 : vector<8x1xf32> to vector<8x8xf32>
    %22 = arith.subf %18, %21 : vector<8x8xf32>
    %23 = math.exp %22 : vector<8x8xf32>
    %cst_22 = arith.constant dense<0.000000e+00> : vector<8xf32>
    %24 = vector.multi_reduction <add>, %23, %cst_22 [1] : vector<8x8xf32> to vector<8xf32>
    %25 = vector.shape_cast %24 : vector<8xf32> to vector<8x1xf32>
    %cst_23 = arith.constant dense<0.000000e+00> : vector<8x8xf32>
    %26 = tpu.matmul %23, %14, %cst_23 {dimension_numbers = #tpu.dot_dimension_numbers<[1], [0], [0], [1], [0, 0, 1, 1], [], []>} : vector<8x8xf32>, vector<8x8xf32>, vector<8x8xf32> -> vector<8x8xf32>
    %27 = tpu.reciprocal %25 : vector<8x1xf32> -> vector<8x1xf32>
    %28 = vector.broadcast %27 : vector<8x1xf32> to vector<8x8xf32>
    %29 = arith.mulf %26, %28 : vector<8x8xf32>
    %cst_24 = arith.constant dense<0.000000e+00> : vector<8x32xf32>
    %30 = tpu.matmul %29, %10, %cst_24 {dimension_numbers = #tpu.dot_dimension_numbers<[1], [0], [0], [1], [0, 0, 1, 1], [], []>} : vector<8x8xf32>, vector<8x32xf32>, vector<8x32xf32> -> vector<8x32xf32>
    %c3_i32 = arith.constant 3 : i32
    %31 = arith.cmpi ne, %arg1, %c3_i32 : i32
    %32 = arith.extui %31 : i1 to i32
    %c0_i32_25 = arith.constant 0 : i32
    %33 = arith.cmpi ne, %32, %c0_i32_25 : i32
    scf.if %33 {
      %c0_28 = arith.constant 0 : index
      %c0_29 = arith.constant 0 : index
      %37 = vector.load %arg9[%c0_28, %c0_29] : memref<8x32xf32, #tpu.memory_space<vmem>>, vector<8x32xf32>
      %38 = arith.addf %37, %30 : vector<8x32xf32>
      %c0_30 = arith.constant 0 : index
      %c0_31 = arith.constant 0 : index
      %39 = vector.load %arg9[%c0_30, %c0_31] : memref<8x32xf32, #tpu.memory_space<vmem>>, vector<8x32xf32>
      tpu.vector_store %arg9[%c0_30, %c0_31], %38 {strides = array<i32>} : memref<8x32xf32, #tpu.memory_space<vmem>>, vector<8x32xf32>,
    } else {
    }
    %c3_i32_26 = arith.constant 3 : i32
    %34 = arith.cmpi eq, %arg1, %c3_i32_26 : i32
    %35 = arith.extui %34 : i1 to i32
    %c0_i32_27 = arith.constant 0 : i32
    %36 = arith.cmpi ne, %35, %c0_i32_27 : i32
    scf.if %36 {
      %c0_28 = arith.constant 0 : index
      %c0_29 = arith.constant 0 : index
      %37 = vector.load %arg9[%c0_28, %c0_29] : memref<8x32xf32, #tpu.memory_space<vmem>>, vector<8x32xf32>
      %38 = arith.addf %37, %30 : vector<8x32xf32>
      %c0_30 = arith.constant 0 : index
      %c0_31 = arith.constant 0 : index
      %c0_32 = arith.constant 0 : index
      %39 = vector.load %arg8[%c0_30, %c0_31, %c0_32] : memref<1x8x32xf32, #tpu.memory_space<vmem>>, vector<1x8x32xf32>
      %40 = vector.shape_cast %39 : vector<1x8x32xf32> to vector<8x32xf32>
      %41 = vector.shape_cast %38 : vector<8x32xf32> to vector<1x8x32xf32>
      tpu.vector_store %arg8[%c0_30, %c0_31, %c0_32], %41 {strides = array<i32>} : memref<1x8x32xf32, #tpu.memory_space<vmem>>, vector<1x8x32xf32>,
    } else {
    }
    return
  }
  func.func @transform_0(%arg0: i32, %arg1: i32) -> (i32, i32, i32) {
    %c0_i32 = arith.constant 0 : i32
    %c0_i32_0 = arith.constant 0 : i32
    %c0_i32_1 = arith.constant 0 : i32
    return %arg0, %c0_i32, %c0_i32_0 : i32, i32, i32
  }
  func.func @transform_1(%arg0: i32, %arg1: i32) -> (i32, i32, i32) {
    %c0_i32 = arith.constant 0 : i32
    %c0_i32_0 = arith.constant 0 : i32
    %c0_i32_1 = arith.constant 0 : i32
    return %arg1, %c0_i32, %c0_i32_0 : i32, i32, i32
  }
  func.func @transform_2(%arg0: i32, %arg1: i32) -> (i32, i32, i32) {
    %c0_i32 = arith.constant 0 : i32
    %c0_i32_0 = arith.constant 0 : i32
    %c0_i32_1 = arith.constant 0 : i32
    return %arg1, %c0_i32, %c0_i32_0 : i32, i32, i32
  }
  func.func @transform_3(%arg0: i32, %arg1: i32) -> (i32, i32, i32) {
    %c0_i32 = arith.constant 0 : i32
    %c0_i32_0 = arith.constant 0 : i32
    %c0_i32_1 = arith.constant 0 : i32
    return %arg1, %c0_i32, %c0_i32_0 : i32, i32, i32
  }
  func.func @transform_4(%arg0: i32, %arg1: i32) -> (i32, i32, i32) {
    %c0_i32 = arith.constant 0 : i32
    %c0_i32_0 = arith.constant 0 : i32
    %c0_i32_1 = arith.constant 0 : i32
    return %arg1, %c0_i32, %c0_i32_0 : i32, i32, i32
  }
  func.func @transform_5(%arg0: i32, %arg1: i32) -> (i32, i32) {
    %c0_i32 = arith.constant 0 : i32
    %c0_i32_0 = arith.constant 0 : i32
    %c0_i32_1 = arith.constant 0 : i32
    return %c0_i32, %c0_i32_0 : i32, i32
  }
  func.func @transform_6(%arg0: i32, %arg1: i32) -> (i32, i32, i32) {
    %c0_i32 = arith.constant 0 : i32
    %c0_i32_0 = arith.constant 0 : i32
    %c0_i32_1 = arith.constant 0 : i32
    return %arg0, %c0_i32, %c0_i32_0 : i32, i32, i32
  }
}

</mosaic_0001>

<bundles_post_ra>
// kernel: tpu_custom_call.1
= control target key start
LH: loop header
LB: loop body
LE: loop exit
PB: predicated region body
PF: predicated region fallthrough
CT: control target
= control target key end

     0   :  { %11 = vsyncpa [#allocation4], 0  ;;  %s1452_s0 = inlined_call_operand.vmem [shape: f32[2,8,32], index: 0, kind: input, shape index: {}]   ;;  %s1453_s1 = inlined_call_operand.vmem [shape: f32[4,32,8], index: 1, kind: input, shape index: {}]   ;;  %s1454_s2 = inlined_call_operand.vmem [shape: f32[4,32,8], index: 2, kind: input, shape index: {}]   ;;  %s1455_s3 = inlined_call_operand.vmem [shape: f32[4,32,8], index: 3, kind: input, shape index: {}]   ;;  %s1456_s4 = inlined_call_operand.vmem [shape: f32[4,8,32], index: 4, kind: input, shape index: {}]   ;;  %s1457_s5 = inlined_call_operand.vmem [shape: f32[1,32], index: 5, kind: input, shape index: {}]   ;;  %s1458_s6 = inlined_call_operand.hbm [shape: f32[2,8,32], index: 6, kind: output, shape index: {}]  }
   0x1   :  { %13 = vsyncpa [#allocation4 + $0x1], 0  ;;  %s1267_s21 = smov 0   ;;  %s1269_s22 = smov 0  }
   0x2   :  { %s1271_s23 = smov 0   ;;  %s1273_s24 = smov 0  }
   0x3   :  { %s1275_s25 = smov 0   ;;  %s1277_s26 = smov 0  }
   0x4   :  { %s1279_s27 = smov 0   ;;  %s1281_s28 = smov 0  }
   0x5 LB: > { %1465 = sst [smem:[#allocation6_spill]] %s1207_s23  ;;  %s957_s29 = sadd.s32 4294967295, %s1227_s28   ;;  %s1227_s28 = sphi %s1281_s28, %s19_s28   ;;  %s1223_s27 = sphi %s1279_s27, %s1481_s27   ;;  %s1219_s26 = sphi %s1277_s26, %s1485_s26   ;;  %s1215_s25 = sphi %s1275_s25, %s1479_s25   ;;  %s1211_s24 = sphi %s1273_s24, %s1478_s24   ;;  %s1207_s23 = sphi %s1271_s23, %s1484_s23   ;;  %s1203_s22 = sphi %s1269_s22, %s1483_s22   ;;  %s1199_s21 = sphi %s1267_s21, %s1482_s21  }
   0x6   : > { %1466 = sst [smem:[#allocation7_spill]] %s1219_s26  ;;  %s958_s30 = sadd.s32 4294967294, %s1227_s28  }
   0x7   : > { %1467 = sst [smem:[#allocation8_spill]] %s1223_s27  ;;  %s28_s7 = sadd.s32 1, %s1219_s26 }
   0x8   : > { %p29_p0 = scmp.ge.s32.totalorder %s28_s7, 4  ;;  %s31_s8 = sadd.s32 1, %s1223_s27 }
   0x9   : > { %p199_p1 = scmp.ne.s32.totalorder %s1207_s23, %s1203_s22  ;;  %p200_p2 = scmp.eq.s32.totalorder %s957_s29, 7 }
   0xa   : > { %s1487_s7 = smov (%p29_p0, %s28_s7), 0  ;;  %s1489_s8 = smov (!%p29_p0, %s31_s8), %s1223_s27 }
   0xb   : > { %1468 = sst [smem:[#allocation9_spill]] %s1487_s7  ;;  %p1316_p3 = por %p200_p2, %p199_p1 }
   0xc   : > { %p205_p4 = scmp.ne.s32.totalorder %s1203_s22, %s1199_s21  ;;  %p33_p5 = scmp.ge.s32.totalorder %s1489_s8, 2 }
   0xd   : > { %p206_p6 = scmp.eq.s32.totalorder %s958_s30, 7  ;;  %p961_p7 = scmp.ge.s32.totalorder %s1227_s28, 1 }
   0xe   : > { %p265_p8 = scmp.lt.s32.totalorder %s1227_s28, 9  ;;  %s1491_s8 = smov (%p33_p5, %s1489_s8), 0 }
   0xf   : > { %1470 = sst [smem:[#allocation10_spill]] %s1491_s8  ;;  %p1326_p9 = por %p206_p6, %p205_p4 }
  0x10   : > { %p266_p10 = pnand %p961_p7, %p265_p8  ;;  %s186_s11 = ssub.s32 %s1223_s27, %s1491_s8 }
  0x11   : > { %s1471_s10 = scalar_select %p1326_p9, 1, 0 }
  0x12   : > { %s189_s12 = sadd.s32 1, %s1207_s23  ;;  %p187_p11 = scmp.eq.s32.totalorder %s186_s11, 0 }
  0x13   : > { %1472 = sst [smem:[#allocation11_spill]] %s1471_s10  ;;  %269 = sbr.rel (%p266_p10) target bundleno = 1026 (0x402), region = 44 }
  0x14   : > { %s1334_s13 = scalar_select %p187_p11, %s1207_s23, %s189_s12  }
  0x15   : > { %s1461_s14 = sand.u32 (!%p266_p10), 1, %s1203_s22   ;;  %p313_p12 = scmp.lt.s32.totalorder (!%p266_p10), %s1215_s25, 1 }
  0x16   : > { %1473 = sst [smem:[#allocation12_spill]] %s1334_s13  ;;  %s1340_s15 = sshll.u32 (!%p266_p10), %s1461_s14, 3 }
  0x17   : > { %p317_p13 = scmp.lt.s32.totalorder (!%p266_p10), %s1211_s24, 3  ;;  %s312_s20 = scalar_lea.vmem (!%p266_p10), [#allocation3], %s1340_s15 }
  0x18   : > { %s314_s16 = scalar_select %p313_p12, %s1215_s25, 1 }
  0x19   : > { %s318_s17 = scalar_select %p317_p13, %s1211_s24, 3 }
  0x1a   : > { %s963_s18 = sshll.u32 %s314_s16, 3  ;;  %p971_p0 = scmp.ne.s32.totalorder %s1211_s24, 0 }
  0x1b   : > { %s1348_s29 = scalar_lea.vmem %s1452_s0, %s963_s18  ;;  %s986_s30 = sshll.u32 %s318_s17, 5 }
  0x1c   : > { %s1353_s8 = scalar_lea.vmem %s1453_s1, %s986_s30  ;;  %s326_s14 = scalar_lea.vmem %s1454_s2, %s986_s30 }
  0x1d   : > { %s1361_s23 = scalar_lea.vmem %s1455_s3, %s986_s30  ;;  %s970_s16 = sshll.u32 %s318_s17, 3 }
  0x1e   : > { %s1366_s18 = scalar_lea.vmem %s1456_s4, %s970_s16  ;;  %339 = sbr.rel (%p971_p0) target bundleno = 37 (0x25), region = 48 }
  0x23   : > { %v972_v0 = vld [vmem:[%s1457_s5] ss:$0 sm:$0xff]  ;;  %vm347_vm0 = vcmask 261120  }
  0x24   : > { %348 = vst.msk [vmem:[#allocation2] sm:$0xff] %vm347_vm0, %v972_v0 }
  0x25 PF: > { %v356_v1 = vld [vmem:[%s326_s14 + $0x18] sm:$0xff]  ;;  %v1229_v2 = vmov 0.0   ;;  %v355_v3 = vld [vmem:[%s326_s14 + $0x10] sm:$0xff]  ;;  %vm1230_vm1 = vmmov 0   ;;  %v354_v4 = vld [vmem:[%s326_s14 + $0x8] sm:$0xff]  ;;  %vm363_vm2 = vcmask 261120  }
  0x26   : > { %1010 = vmatprep.subr.mxu0 %v1229_v2  ;;  %1018 = vmatprep.mubr.msk.f32.mxu0 %vm1230_vm1, %v1229_v2  ;;  %v360_v5 = vld [vmem:[%s1361_s23 + $0x18] sm:$0xff]  ;;  %v359_v6 = vld [vmem:[%s1361_s23 + $0x10] sm:$0xff]  ;;  %v353_v7 = vld [vmem:[%s326_s14] sm:$0xff]  ;;  %vm577_vm3 = vcmask 64512   ;;  %p980_p1 = scmp.eq.s32.totalorder %s1211_s24, 3 }
  0x27   : > { %1011 = vmatpush3.msra.mxu0 %v356_v1  ;;  %1021 = vmatprep.subr.mxu1 %v1229_v2  ;;  %v358_v8 = vld [vmem:[%s1361_s23 + $0x8] sm:$0xff]  ;;  %v362_v9 = vld [vmem:[%s1348_s29] sm:$0xff]  ;;  %v352_v10 = vld [vmem:[%s1353_s8 + $0x18] sm:$0xff] }
  0x28   : > { %1012 = vmatprep.subr.mxu0 %v1229_v2  ;;  %1029 = vmatprep.mubr.msk.f32.mxu1 %vm1230_vm1, %v1229_v2  ;;  %v351_v11 = vld [vmem:[%s1353_s8 + $0x10] sm:$0xff]  ;;  %v350_v12 = vld [vmem:[%s1353_s8 + $0x8] sm:$0xff]  ;;  %v349_v13 = vld [vmem:[%s1353_s8] sm:$0xff] }
  0x29   : > { %1013 = vmatpush3.msra.mxu0 %v355_v3  ;;  %1022 = vmatpush3.msra.mxu1 %v360_v5  ;;  %v357_v14 = vld [vmem:[%s1361_s23] sm:$0xff] }
  0x2a   : > { %1014 = vmatprep.subr.mxu0 %v1229_v2  ;;  %1023 = vmatprep.subr.mxu1 %v1229_v2  ;;  %v361_v29 = vld [vmem:[%s1366_s18] sm:$0xff] }
  0x2b   : > { %1015 = vmatpush3.msra.mxu0 %v354_v4  ;;  %1024 = vmatpush3.msra.mxu1 %v359_v6 }
  0x2c   : > { %1016 = vmatprep.subr.mxu0 %v1229_v2  ;;  %1025 = vmatprep.subr.mxu1 %v1229_v2 }
  0x2d   : > { %1017 = vmatpush3.msra.mxu0 %v353_v7  ;;  %1026 = vmatpush3.msra.mxu1 %v358_v8 }
  0x2e   : > { %1019 = vmatmul.mubr.msk.f32.vlgmr.msra.gmra.mxu0 %vm363_vm2, %v362_v9  ;;  %1032 = vmatprep.subr.mxu0 %v1229_v2 }
  0x2f   : > { %1033 = vmatpush3.msra.mxu0 %v352_v10  ;;  %1040 = vmatprep.mubr.msk.f32.mxu0 %vm1230_vm1, %v1229_v2 }
  0x30   : > { %1034 = vmatprep.subr.mxu0 %v1229_v2  ;;  %1027 = vmatprep.subr.mxu1 %v1229_v2 }
  0x31   : > { %1035 = vmatpush3.msra.mxu0 %v351_v11  ;;  %1028 = vmatpush3.msra.mxu1 %v357_v14 }
  0x32   : > { %1036 = vmatprep.subr.mxu0 %v1229_v2  ;;  %1043 = vmatprep.subr.mxu1 %v1229_v2 }
  0x33   : > { %1037 = vmatpush3.msra.mxu0 %v350_v12  ;;  %1030 = vmatmul.mubr.msk.f32.vlgmr.msra.gmra.mxu1 %vm363_vm2, %v362_v9 }
  0x34   : > { %1038 = vmatprep.subr.mxu0 %v1229_v2  ;;  %1045 = vmatprep.mubr.msk.f32.mxu1 %vm1230_vm1, %v1229_v2 }
  0x35   : > { %1039 = vmatpush3.msra.mxu0 %v349_v13 }
  0x36   : > { %1041 = vmatmul.mubr.msk.f32.vlgmr.msra.gmra.mxu0 %vm363_vm2, %v362_v9  ;;  %1053 = vmatprep.subr.mxu0 %v1229_v2 }
  0x37   : > { %1055 = vmatprep.mubr.msk.f32.mxu0 %vm1230_vm1, %v1229_v2  ;;  %1054 = vmatpush3.msra.mxu0 %v361_v29 }
  0xee   : > { %v433_v15 = vpop.f32.mrf.mxu0 }
  0xef   : > { %1044 = vmatpush3.xpose.msk.msra.mxu1 %vm577_vm3, %v433_v15 }
  0xf0   : > { %v1020_v16 = vpop.f32.mrf.mxu0  ;;  %1048 = vmatprep.subr.mxu1 %v1229_v2 }
  0xf3   : > { %v503_v19 = vpop.f32.mrf.mxu1 }
  0xf5   : > { %v1031_v20 = vpop.f32.mrf.mxu1 }
  0xf6   : > { %v573_v17 = vpop.f32.mrf.mxu0 }
  0xf7   : > { %1046 = vmatmul.mubr.msk.f32.vlgmr.msra.gmra.mxu1 %vm577_vm3, %v573_v17 }
  0xf8   : > { %v1042_v18 = vpop.f32.mrf.mxu0  ;;  %1050 = vmatprep.mubr.msk.f32.mxu1 %vm1230_vm1, %v1229_v2  ;;  %1049 = vmatpush3.msra.mxu1 %v503_v19 }
 0x1b7   : > { %v650_v21 = vpop.f32.mrf.mxu1 }
 0x1b8   : > { %v654_v22 = vsel %vm577_vm3, %v650_v21, -inf }
 0x1b9   : > { %655 = vmax.xlane.f32.xlu0 %v654_v22  ;;  %v1047_v23 = vpop.f32.mrf.mxu1 }
 0x242   : > { %v656_v24 = vpop.xlane.xlu0 %655 }
 0x243   : > { %v657_v25 = vsub.f32 %v650_v21, %v656_v24 }
 0x245   : > { %v658_v26 = vmul.f32 1.442695, %v657_v25 }
 0x247   : > { %1131 = vpow2.f32 %v658_v26 }
 0x254   : > { %v1132_v27 = vpop.eup %1131 }
 0x255   : > { %1051 = vmatmul.mubr.msk.f32.vlgmr.msra.gmra.mxu1 %vm577_vm3, %v1132_v27  ;;  %v660_v28 = vsel %vm577_vm3, %v1132_v27, 0.0 }
 0x256   : > { %661 = vadd.xlane.f32.xlu0 %v660_v28 }
 0x2df   : > { %v662_v30 = vpop.xlane.xlu0 %661 }
 0x2e0   : > { %1133 = vrcp.f32 %v662_v30 }
 0x2ed   : > { %v1134_v31 = vpop.eup %1133 }
 0x315   : > { %v732_v32 = vpop.f32.mrf.mxu1 }
 0x316   : > { %v737_v33 = vmul.f32 %v1134_v31, %v732_v32 }
 0x317   : > { %v1052_v34 = vpop.f32.mrf.mxu1 }
 0x318   : > { %1056 = vmatmul.mubr.msk.f32.vlgmr.msra.gmra.mxu0 %vm577_vm3, %v737_v33 }
 0x3d6   : > { %814 = sbr.rel (%p980_p1) target bundleno = 991 (0x3df), region = 52 }
 0x3d8   : > { %v807_v35 = vpop.f32.mrf.mxu0 }
 0x3da   : > { %v1057_v36 = vpop.f32.mrf.mxu0 }
 0x3db   : > { %v815_v37 = vld [vmem:[#allocation2] sm:$0xff] }
 0x3dc   : > { %v816_v38 = vadd.f32 %v815_v37, %v807_v35 }
 0x3de   : > { %817 = vst.msk [vmem:[#allocation2] sm:$0xff] %vm363_vm2, %v816_v38 }
 0x3df PF: > { %p981_p2 = scmp.ne.s32.totalorder %s1211_s24, 3 }
 0x3e1   : > { %821 = sbr.rel (%p981_p2) target bundleno = 1002 (0x3ea), region = 56 }
 0x3e6   : > { %v822_v39 = vld [vmem:[#allocation2] sm:$0xff] }
 0x3e7   : > { %v823_v40 = vadd.f32 %v822_v39, %v807_v35 }
 0x3e9   : > { %824 = vst.msk [vmem:[%s312_s20] sm:$0xff] %vm363_vm2, %v823_v40 }
 0x3ea PF: > { %s983_s23 = sshll.u32 %s1215_s25, 7  ;;  %s839_s8 = sshll.u32 %s312_s20, 4  ;;  %s840_s8 = int_to_ptr.vmem [resolvable:$true] %s839_s8 }
 0x3eb   : > { %s837_s7 = scalar_lea.hbm %s1458_s6, %s983_s23  ;;  %s1474_s24 = sand.u32 1, %s1203_s22  }
 0x3ec   : > { %s826_s10 = scalar_lea.sflag [#allocation4], %s1474_s24  ;;  %s1135_s13 = scalar_lea.vmem %s840_s8, 128 }
 0x3ed   : > { %p1136_p4 = scmp.ne.s32.totalorder %s840_s8, %s1135_s13  ;;  %s1231_s14 = smov [#allocation3]  }
 0x3ee   : > { %s1139_s17 = sshll.u32 %s1231_s14, 4  ;;  %s1140_s17 = int_to_ptr.vmem [resolvable:$false] %s1139_s17 }
 0x3ef   : > { %p1137_p5 = pnand %p1136_p4, %p1316_p3  ;;  %s1141_s29 = scalar_lea.vmem %s1140_s17, 256 }
 0x3f0   : > { %p1142_p7 = scmp.lt.s32.totalorder %s840_s8, %s1140_s17  ;;  %p1143_p8 = scmp.lt.s32.totalorder %s1141_s29, %s1135_s13 }
 0x3f1   : > { %p1138_p6 = pneg %p1137_p5 }
 0x3f2   : > { %p1144_p10 = por %p1143_p8, %p1142_p7 }
 0x3f4   : > { %p1145_p11 = pnand %p1144_p10, %p1138_p6 }
 0x3f6   : > { %1148 = shalt.err (!%p1145_p11)
}
 0x3f7   : > { %s1149_s25 = scalar_lea.hbm %s837_s7, 128  ;;  %s1153_s16 = scalar_lea.hbm %s1458_s6, 256 }
 0x3f8   : > { %p1150_p12 = scmp.ne.s32.totalorder %s837_s7, %s1149_s25  ;;  %p1154_p1 = scmp.lt.s32.totalorder %s837_s7, %s1458_s6 }
 0x3f9   : > { %p1155_p2 = scmp.lt.s32.totalorder %s1153_s16, %s1149_s25 }
 0x3fa   : > { %p1151_p13 = pnand %p1150_p12, %p1316_p3 }
 0x3fb   : > { %p1156_p4 = por %p1155_p2, %p1154_p1 }
 0x3fc   : > { %p1152_p0 = pneg %p1151_p13 }
 0x3fe   : > { %p1157_p5 = pnand %p1156_p4, %p1152_p0 }
 0x400   : > { %1160 = shalt.err (!%p1157_p5)
}
 0x401   : > { %1058 = dma.vmem_to_hbm [thread:$0]  (%p1316_p3), %s840_s8, 128, %s837_s7, %s826_s10  }
 0x402 PF: > { %p1064_p6 = scmp.ge.s32.totalorder %s1227_s28, 2  ;;  %s851_s11 = sand.u32 1, %s1199_s21  }
 0x403   : > { %s852_s12 = scalar_lea.sflag [#allocation4], %s851_s11 }
 0x404   : > { %p1061_p7 = pnand %p1064_p6, %p1326_p9 }
 0x406   : > { %p1062_p8 = pneg %p1061_p7 }
 0x408   : > { %1194 = dma.done.wait (%p1062_p8), %s852_s12, 128  }
 0x409   : > { %1196 = vsyncadd (%p1062_p8), %s852_s12, 4294967168  ;;  %s19_s28 = sadd.s32 1, %s1227_s28   ;;  %s1476_s23 = sld [smem:[#allocation6_spill]] }
 0x40a   : > { %p16_p10 = scmp.ge.s32.totalorder %s19_s28, 10   ;;  %s1477_s26 = sld [smem:[#allocation12_spill]] }
 0x40b   : > { %s1478_s24 = sld [smem:[#allocation7_spill]]  ;;  %s1482_s21 = smov %s1203_s22 }
 0x40c   : > { %s1479_s25 = sld [smem:[#allocation8_spill]] }
 0x40d   : > { %s1480_s9 = sld [smem:[#allocation9_spill]] }
 0x40e   : > { %s1481_s27 = sld [smem:[#allocation10_spill]] }
 0x40f   : > { %s1483_s22 = smov %s1476_s23  ;;  %18 = sbr.rel (!%p16_p10) target bundleno = 5 (0x5), region = 103 }
 0x410   : > { %s1484_s23 = smov %s1477_s26 }
 0x413   : > { %s1485_s26 = smov %s1480_s9 }
 0x414   :  { %857 = vsyncpa [#allocation4], 1 }
 0x415   :  { %859 = vsyncpa [#allocation4 + $0x1], 1 }

</bundles_post_ra>
